<compile_context>
chip_gen: v7x
topology: tpu7x:2x2x1
jax: 0.10.0
libtpu: 0.0.40
codegen_flags: <defaults>
</compile_context>

<pallas_src>
import jax
import jax.numpy as jnp
from jax.experimental import pallas as pl
from jax.experimental.pallas import tpu as pltpu


def _round_up(n: int, m: int) -> int:
    return (n + m - 1) // m * m


def mnet_kernel(x_ref, w1_ref, b1_ref, w2_ref, b2_ref, w3_ref, b3_ref, o_ref):
    """Fused 3-layer MLP; the whole per-tile compute stays in VMEM/vregs."""
    cdt = w1_ref.dtype  # matmul operand dtype (bf16 by default)

    def layer(h, w_ref, b_ref):
        z = jnp.dot(h.astype(cdt), w_ref[...], preferred_element_type=jnp.float32)
        return jnp.tanh(z + b_ref[...])  # bias + tanh in f32 (portable to v5e)

    h = layer(x_ref[...], w1_ref, b1_ref)
    h = layer(h, w2_ref, b2_ref)
    h = layer(h, w3_ref, b3_ref)
    o_ref[...] = h.astype(o_ref.dtype)


def mnet_forward(x, params, *, tile_b=None, compute_dtype=jnp.bfloat16):
    """x: [B, in_len] float32 -> [B, in_len] float32."""
    w1, b1, w2, b2, w3, b3 = params
    B, in_len = x.shape
    hidden = w1.shape[1]

    # ---- pad feature dims to lane multiples (128); pick the batch tile -----
    LANE = 128
    in_p = _round_up(in_len, LANE)
    hid_p = _round_up(hidden, LANE)

    if tile_b is None:
        tile_b = _round_up(B, 8) if B <= 512 else 256
    B_p = _round_up(B, tile_b)
    grid = (B_p // tile_b,)

    def pad2(a, r, c):
        return jnp.zeros((r, c), a.dtype).at[: a.shape[0], : a.shape[1]].set(a)

    xp = pad2(x, B_p, in_p).astype(compute_dtype)
    w1p = pad2(w1, in_p, hid_p).astype(compute_dtype)
    w2p = pad2(w2, hid_p, hid_p).astype(compute_dtype)
    w3p = pad2(w3, hid_p, in_p).astype(compute_dtype)
    b1p = pad2(b1, 1, hid_p).astype(jnp.float32)
    b2p = pad2(b2, 1, hid_p).astype(jnp.float32)
    b3p = pad2(b3, 1, in_p).astype(jnp.float32)

    # Weights / biases are grid-invariant: constant index_map, full block
    # (fetched once, resident in VMEM across all batch tiles).
    def full(shape):
        return pl.BlockSpec(shape, lambda i: (0, 0))

    # ---- VMEM budget + cost estimate ----------------------------------------
    cdt_bytes = jnp.dtype(compute_dtype).itemsize
    weight_bytes = (in_p * hid_p + hid_p * hid_p + hid_p * in_p) * cdt_bytes
    bias_bytes = (2 * hid_p + in_p) * 4
    act_bytes = tile_b * (in_p * cdt_bytes + in_p * 4 + 2 * hid_p * 4)
    est_vmem = 2 * (weight_bytes + bias_bytes) + 2 * act_bytes
    vmem_limit = int(min(max(2 * est_vmem + (8 << 20), 32 << 20), 64 << 20))

    flops = 2 * B_p * (in_p * hid_p + hid_p * hid_p + hid_p * in_p)
    transcendentals = B_p * (2 * hid_p + in_p)
    bytes_accessed = B_p * in_p * (cdt_bytes + 4) + weight_bytes + bias_bytes

    out_p = pl.pallas_call(
        mnet_kernel,
        out_shape=jax.ShapeDtypeStruct((B_p, in_p), jnp.float32),
        grid_spec=pltpu.PrefetchScalarGridSpec(
            num_scalar_prefetch=0,
            grid=grid,
            in_specs=[
                pl.BlockSpec((tile_b, in_p), lambda i: (i, 0)),  # x tile
                full((in_p, hid_p)),   # W1
                full((1, hid_p)),      # b1
                full((hid_p, hid_p)),  # W2
                full((1, hid_p)),      # b2
                full((hid_p, in_p)),   # W3
                full((1, in_p)),       # b3
            ],
            out_specs=pl.BlockSpec((tile_b, in_p), lambda i: (i, 0)),
        ),
        compiler_params=pltpu.CompilerParams(
            dimension_semantics=("parallel",),
            vmem_limit_bytes=vmem_limit,
        ),
        cost_estimate=pl.CostEstimate(
            flops=flops,
            transcendentals=transcendentals,
            bytes_accessed=bytes_accessed,
        ),
    )(xp, w1p, b1p, w2p, b2p, w3p, b3p)

    return out_p[:B, :in_len]


def init_mnet_params(key, in_len, hidden):
    """PyTorch nn.Linear-style init (uniform +-1/sqrt(fan_in)).

    Weights returned as [in_features, out_features] (transposed vs. torch)."""
    ks = jax.random.split(key, 6)

    def lin(kw, kb, fan_in, fan_out):
        bound = 1.0 / jnp.sqrt(jnp.float32(fan_in))
        w = jax.random.uniform(kw, (fan_in, fan_out), jnp.float32, -bound, bound)
        b = jax.random.uniform(kb, (1, fan_out), jnp.float32, -bound, bound)
        return w, b

    w1, b1 = lin(ks[0], ks[1], in_len, hidden)
    w2, b2 = lin(ks[2], ks[3], hidden, hidden)
    w3, b3 = lin(ks[4], ks[5], hidden, in_len)
    return (w1, b1, w2, b2, w3, b3)


def mnet_ref(x, params, compute_dtype=jnp.float32):
    """Pure-JAX reference; compute_dtype mimics the kernel's matmul casting."""
    w1, b1, w2, b2, w3, b3 = params

    def layer(h, w, b):
        z = jnp.dot(h.astype(compute_dtype), w.astype(compute_dtype),
                    preferred_element_type=jnp.float32)
        return jnp.tanh(z + b)

    h = layer(x, w1, b1)
    h = layer(h, w2, b2)
    return layer(h, w3, b3)


if __name__ == "__main__":
    key = jax.random.PRNGKey(0)
    kx, kp = jax.random.split(key)

    batch, in_len, hidden = 16, 16, 32
    x = jax.random.normal(kx, (batch, in_len), jnp.float32)
    params = init_mnet_params(kp, in_len, hidden)

    out = jax.block_until_ready(mnet_forward(x, params))
    assert out.shape == (batch, in_len)
    assert out.dtype == jnp.float32

    # Tight check vs. a reference using the same bf16-operand / f32-accumulate
    # pattern, plus a loose sanity check vs. the full-f32 reference.
    ref_bf16 = mnet_ref(x, params, compute_dtype=jnp.bfloat16)
    ref_f32 = mnet_ref(x, params)
    assert jnp.allclose(out, ref_bf16, atol=2e-3, rtol=0), float(
        jnp.max(jnp.abs(out - ref_bf16)))
    assert jnp.allclose(out, ref_f32, atol=5e-2, rtol=0), float(
        jnp.max(jnp.abs(out - ref_f32)))

    print("KERNEL_OK")
</pallas_src>

<mosaic_0001>
module attributes {stable_mosaic.version = 11 : i64} {
  func.func @mnet_kernel(%arg0: i32, %arg1: memref<16x128xbf16, #tpu.memory_space<vmem>>, %arg2: memref<128x128xbf16, #tpu.memory_space<vmem>>, %arg3: memref<1x128xf32, #tpu.memory_space<vmem>>, %arg4: memref<128x128xbf16, #tpu.memory_space<vmem>>, %arg5: memref<1x128xf32, #tpu.memory_space<vmem>>, %arg6: memref<128x128xbf16, #tpu.memory_space<vmem>>, %arg7: memref<1x128xf32, #tpu.memory_space<vmem>>, %arg8: memref<16x128xf32, #tpu.memory_space<vmem>>) attributes {dimension_semantics = [#tpu.dimension_semantics<parallel>], iteration_bounds = array<i64: 1>, scalar_prefetch = 0 : i64, scratch_operands = 0 : i64, tpu.core_type = #tpu.core_type<tc>, window_params = [{transform_indices = @transform_0, window_bounds = array<i64: 16, 128>}, {pipeline_mode = #tpu.pipeline_mode<synchronous>, transform_indices = @transform_1, window_bounds = array<i64: 128, 128>}, {pipeline_mode = #tpu.pipeline_mode<synchronous>, transform_indices = @transform_2, window_bounds = array<i64: 1, 128>}, {pipeline_mode = #tpu.pipeline_mode<synchronous>, transform_indices = @transform_3, window_bounds = array<i64: 128, 128>}, {pipeline_mode = #tpu.pipeline_mode<synchronous>, transform_indices = @transform_4, window_bounds = array<i64: 1, 128>}, {pipeline_mode = #tpu.pipeline_mode<synchronous>, transform_indices = @transform_5, window_bounds = array<i64: 128, 128>}, {pipeline_mode = #tpu.pipeline_mode<synchronous>, transform_indices = @transform_6, window_bounds = array<i64: 1, 128>}, {transform_indices = @transform_7, window_bounds = array<i64: 16, 128>}]} {
    %c0 = arith.constant 0 : index
    %c0_0 = arith.constant 0 : index
    %0 = vector.load %arg1[%c0, %c0_0] : memref<16x128xbf16, #tpu.memory_space<vmem>>, vector<16x128xbf16>
    %c0_1 = arith.constant 0 : index
    %c0_2 = arith.constant 0 : index
    %1 = vector.load %arg2[%c0_1, %c0_2] : memref<128x128xbf16, #tpu.memory_space<vmem>>, vector<128x128xbf16>
    %cst = arith.constant dense<0.000000e+00> : vector<16x128xf32>
    %2 = tpu.matmul %0, %1, %cst {dimension_numbers = #tpu.dot_dimension_numbers<[1], [0], [0], [1], [0, 0, 1, 1], [], []>} : vector<16x128xbf16>, vector<128x128xbf16>, vector<16x128xf32> -> vector<16x128xf32>
    %c0_3 = arith.constant 0 : index
    %c0_4 = arith.constant 0 : index
    %3 = vector.load %arg3[%c0_3, %c0_4] : memref<1x128xf32, #tpu.memory_space<vmem>>, vector<1x128xf32>
    %4 = vector.broadcast %3 : vector<1x128xf32> to vector<16x128xf32>
    %5 = arith.addf %2, %4 : vector<16x128xf32>
    %6 = math.tanh %5 : vector<16x128xf32>
    %7 = arith.truncf %6 : vector<16x128xf32> to vector<16x128xbf16>
    %c0_5 = arith.constant 0 : index
    %c0_6 = arith.constant 0 : index
    %8 = vector.load %arg4[%c0_5, %c0_6] : memref<128x128xbf16, #tpu.memory_space<vmem>>, vector<128x128xbf16>
    %cst_7 = arith.constant dense<0.000000e+00> : vector<16x128xf32>
    %9 = tpu.matmul %7, %8, %cst_7 {dimension_numbers = #tpu.dot_dimension_numbers<[1], [0], [0], [1], [0, 0, 1, 1], [], []>} : vector<16x128xbf16>, vector<128x128xbf16>, vector<16x128xf32> -> vector<16x128xf32>
    %c0_8 = arith.constant 0 : index
    %c0_9 = arith.constant 0 : index
    %10 = vector.load %arg5[%c0_8, %c0_9] : memref<1x128xf32, #tpu.memory_space<vmem>>, vector<1x128xf32>
    %11 = vector.broadcast %10 : vector<1x128xf32> to vector<16x128xf32>
    %12 = arith.addf %9, %11 : vector<16x128xf32>
    %13 = math.tanh %12 : vector<16x128xf32>
    %14 = arith.truncf %13 : vector<16x128xf32> to vector<16x128xbf16>
    %c0_10 = arith.constant 0 : index
    %c0_11 = arith.constant 0 : index
    %15 = vector.load %arg6[%c0_10, %c0_11] : memref<128x128xbf16, #tpu.memory_space<vmem>>, vector<128x128xbf16>
    %cst_12 = arith.constant dense<0.000000e+00> : vector<16x128xf32>
    %16 = tpu.matmul %14, %15, %cst_12 {dimension_numbers = #tpu.dot_dimension_numbers<[1], [0], [0], [1], [0, 0, 1, 1], [], []>} : vector<16x128xbf16>, vector<128x128xbf16>, vector<16x128xf32> -> vector<16x128xf32>
    %c0_13 = arith.constant 0 : index
    %c0_14 = arith.constant 0 : index
    %17 = vector.load %arg7[%c0_13, %c0_14] : memref<1x128xf32, #tpu.memory_space<vmem>>, vector<1x128xf32>
    %18 = vector.broadcast %17 : vector<1x128xf32> to vector<16x128xf32>
    %19 = arith.addf %16, %18 : vector<16x128xf32>
    %20 = math.tanh %19 : vector<16x128xf32>
    %c0_15 = arith.constant 0 : index
    %c0_16 = arith.constant 0 : index
    %21 = vector.load %arg8[%c0_15, %c0_16] : memref<16x128xf32, #tpu.memory_space<vmem>>, vector<16x128xf32>
    tpu.vector_store %arg8[%c0_15, %c0_16], %20 {strides = array<i32>} : memref<16x128xf32, #tpu.memory_space<vmem>>, vector<16x128xf32>,
    return
  }
  func.func @transform_0(%arg0: i32) -> (i32, i32) {
    %c0_i32 = arith.constant 0 : i32
    %c0_i32_0 = arith.constant 0 : i32
    return %arg0, %c0_i32 : i32, i32
  }
  func.func @transform_1(%arg0: i32) -> (i32, i32) {
    %c0_i32 = arith.constant 0 : i32
    %c0_i32_0 = arith.constant 0 : i32
    %c0_i32_1 = arith.constant 0 : i32
    return %c0_i32, %c0_i32_0 : i32, i32
  }
  func.func @transform_2(%arg0: i32) -> (i32, i32) {
    %c0_i32 = arith.constant 0 : i32
    %c0_i32_0 = arith.constant 0 : i32
    %c0_i32_1 = arith.constant 0 : i32
    return %c0_i32, %c0_i32_0 : i32, i32
  }
  func.func @transform_3(%arg0: i32) -> (i32, i32) {
    %c0_i32 = arith.constant 0 : i32
    %c0_i32_0 = arith.constant 0 : i32
    %c0_i32_1 = arith.constant 0 : i32
    return %c0_i32, %c0_i32_0 : i32, i32
  }
  func.func @transform_4(%arg0: i32) -> (i32, i32) {
    %c0_i32 = arith.constant 0 : i32
    %c0_i32_0 = arith.constant 0 : i32
    %c0_i32_1 = arith.constant 0 : i32
    return %c0_i32, %c0_i32_0 : i32, i32
  }
  func.func @transform_5(%arg0: i32) -> (i32, i32) {
    %c0_i32 = arith.constant 0 : i32
    %c0_i32_0 = arith.constant 0 : i32
    %c0_i32_1 = arith.constant 0 : i32
    return %c0_i32, %c0_i32_0 : i32, i32
  }
  func.func @transform_6(%arg0: i32) -> (i32, i32) {
    %c0_i32 = arith.constant 0 : i32
    %c0_i32_0 = arith.constant 0 : i32
    %c0_i32_1 = arith.constant 0 : i32
    return %c0_i32, %c0_i32_0 : i32, i32
  }
  func.func @transform_7(%arg0: i32) -> (i32, i32) {
    %c0_i32 = arith.constant 0 : i32
    %c0_i32_0 = arith.constant 0 : i32
    return %arg0, %c0_i32 : i32, i32
  }
}

</mosaic_0001>

<bundles_post_ra>
// kernel: tpu_custom_call.1
= control target key start
LH: loop header
LB: loop body
LE: loop exit
PB: predicated region body
PF: predicated region fallthrough
CT: control target
= control target key end

     0   :  { %12 = vsyncpa [#allocation3], 0  ;;  %s913_s0 = inlined_call_operand.hbm [shape: bf16[16,128], index: 0, kind: input, shape index: {}]   ;;  %s914_s1 = inlined_call_operand.hbm [shape: bf16[128,128], index: 1, kind: input, shape index: {}]   ;;  %s915_s2 = inlined_call_operand.vmem [shape: f32[1,128], index: 2, kind: input, shape index: {}]   ;;  %s916_s3 = inlined_call_operand.hbm [shape: bf16[128,128], index: 3, kind: input, shape index: {}]   ;;  %s917_s4 = inlined_call_operand.vmem [shape: f32[1,128], index: 4, kind: input, shape index: {}]   ;;  %s918_s5 = inlined_call_operand.hbm [shape: bf16[128,128], index: 5, kind: input, shape index: {}]   ;;  %s919_s6 = inlined_call_operand.vmem [shape: f32[1,128], index: 6, kind: input, shape index: {}]   ;;  %s920_s7 = inlined_call_operand.hbm [shape: f32[16,128], index: 7, kind: output, shape index: {}]  }
   0x1   :  { %13 = vsyncpa [#allocation6], 0 }
   0x2   :  { %14 = vsyncpa [#allocation9], 0 }
   0x3   :  { %15 = vsyncpa [#allocation4], 0  ;;  %s737_s24 = smov [#allocation5]   ;;  %s738_s26 = smov [#allocation2]  }
   0x4   :  { %s33_s25 = sshll.u32 %s737_s24, 4  ;;  %s21_s27 = sshll.u32 %s738_s26, 4  ;;  %s34_s25 = int_to_ptr.vmem [resolvable:$true] %s33_s25  ;;  %s788_s27 = int_to_ptr.vmem [resolvable:$true] %s21_s27 }
   0x5   :  { %s619_s30 = scalar_lea.hbm %s914_s1, 1024 }
   0x6   :  { %p620_p0 = scmp.ne.s32.totalorder %s914_s1, %s619_s30  ;;  %p623_p1 = scmp.lt.u32.totalorder %s619_s30, %s914_s1 }
   0x8   :  { %p625_p2 = pnand %p623_p1, %p620_p0 }
   0xa   :  { %628 = shalt.err (!%p625_p2)
}
   0xb   :  { %s629_s12 = scalar_lea.vmem %s34_s25, 1024  ;;  %p634_p4 = scmp.lt.s32.totalorder %s34_s25, %s34_s25 }
   0xc   :  { %p630_p3 = scmp.ne.s32.totalorder %s34_s25, %s629_s12  ;;  %p635_p5 = scmp.lt.s32.totalorder %s629_s12, %s629_s12 }
   0xe   :  { %p636_p6 = por %p635_p5, %p634_p4 }
  0x10   :  { %p637_p7 = pnand %p636_p6, %p630_p3 }
  0x12   :  { %640 = shalt.err (!%p637_p7)
}
  0x13   :  { %s739_s13 = smov 64   ;;  %s740_s14 = smov 4  }
  0x14   :  { %39 = dma.hbm_to_vmem [thread:$0]  %s914_s1, 1024, %s34_s25, [#allocation6], %s739_s13, %s739_s13, %s740_s14  }
  0x15   :  { %s641_s19 = scalar_lea.hbm %s913_s0, 128 }
  0x16   :  { %p642_p8 = scmp.ne.s32.totalorder %s913_s0, %s641_s19  ;;  %p645_p9 = scmp.lt.u32.totalorder %s641_s19, %s913_s0 }
  0x18   :  { %p647_p10 = pnand %p645_p9, %p642_p8 }
  0x1a   :  { %650 = shalt.err (!%p647_p10)
}
  0x1b   :  { %s651_s24 = scalar_lea.vmem %s788_s27, 128  ;;  %p656_p12 = scmp.lt.s32.totalorder %s788_s27, %s788_s27 }
  0x1c   :  { %p652_p11 = scmp.ne.s32.totalorder %s788_s27, %s651_s24  ;;  %p657_p13 = scmp.lt.s32.totalorder %s651_s24, %s651_s24 }
  0x1e   :  { %p658_p0 = por %p657_p13, %p656_p12 }
  0x20   :  { %p659_p1 = pnand %p658_p0, %p652_p11 }
  0x22   :  { %662 = shalt.err (!%p659_p1)
}
  0x23   :  { %27 = dma.hbm_to_vmem [thread:$0]  %s913_s0, 128, %s788_s27, [#allocation3], %s739_s13, %s739_s13, %s740_s14  }
  0x24   :  { %s741_s26 = smov [#allocation7]   ;;  %s742_s29 = smov [#allocation8]  }
  0x25   :  { %s47_s28 = sshll.u32 %s741_s26, 4  ;;  %s61_s30 = sshll.u32 %s742_s29, 4  ;;  %s48_s28 = int_to_ptr.vmem [resolvable:$true] %s47_s28  ;;  %s825_s30 = int_to_ptr.vmem [resolvable:$true] %s61_s30 }
  0x26   :  { %s663_s10 = scalar_lea.hbm %s916_s3, 1024 }
  0x27   :  { %p664_p2 = scmp.ne.s32.totalorder %s916_s3, %s663_s10  ;;  %p667_p3 = scmp.lt.u32.totalorder %s663_s10, %s916_s3 }
  0x29   :  { %p669_p4 = pnand %p667_p3, %p664_p2 }
  0x2b   :  { %672 = shalt.err (!%p669_p4)
}
  0x2c   :  { %s673_s0 = scalar_lea.vmem %s48_s28, 1024  ;;  %p678_p6 = scmp.lt.s32.totalorder %s48_s28, %s48_s28 }
  0x2d   :  { %p674_p5 = scmp.ne.s32.totalorder %s48_s28, %s673_s0  ;;  %p679_p7 = scmp.lt.s32.totalorder %s673_s0, %s673_s0 }
  0x2f   :  { %p680_p8 = por %p679_p7, %p678_p6 }
  0x31   :  { %p681_p9 = pnand %p680_p8, %p674_p5 }
  0x33   :  { %684 = shalt.err (!%p681_p9)
}
  0x34   :  { %53 = dma.hbm_to_vmem [thread:$0]  %s916_s3, 1024, %s48_s28, [#allocation6], %s739_s13, %s739_s13, %s740_s14  }
  0x35   :  { %s685_s20 = scalar_lea.hbm %s918_s5, 1024 }
  0x36   :  { %p686_p10 = scmp.ne.s32.totalorder %s918_s5, %s685_s20  ;;  %p689_p11 = scmp.lt.u32.totalorder %s685_s20, %s918_s5 }
  0x38   :  { %p691_p12 = pnand %p689_p11, %p686_p10 }
  0x3a   :  { %694 = shalt.err (!%p691_p12)
}
  0x3b   :  { %s695_s1 = scalar_lea.vmem %s825_s30, 1024  ;;  %p700_p0 = scmp.lt.s32.totalorder %s825_s30, %s825_s30 }
  0x3c   :  { %p696_p13 = scmp.ne.s32.totalorder %s825_s30, %s695_s1  ;;  %p701_p1 = scmp.lt.s32.totalorder %s695_s1, %s695_s1 }
  0x3e   :  { %p702_p2 = por %p701_p1, %p700_p0 }
  0x40   :  { %p703_p3 = pnand %p702_p2, %p696_p13 }
  0x42   :  { %706 = shalt.err (!%p703_p3)
}
  0x43   :  { %67 = dma.hbm_to_vmem [thread:$0]  %s918_s5, 1024, %s825_s30, [#allocation9], %s739_s13, %s739_s13, %s740_s14  }
  0x44   :  { %729 = dma.done.wait [#allocation3], 128  }
  0x45   :  { %730 = vsyncadd [#allocation3], 4294967168 }
  0x46   :  { %731 = dma.done.wait [#allocation6], 2048  }
  0x47   :  { %732 = vsyncadd [#allocation6], 4294965248 }
  0x48   :  { %733 = dma.done.wait [#allocation9], 1024  }
  0x49   :  { %734 = vsyncadd [#allocation9], 4294966272  ;;  %v743_v0 = vmov 0.0   ;;  %vm744_vm0 = vmmov 0   ;;  %v582_v1 = vld [vmem:[#allocation5] sm:$0xff]   ;;  %v583_v2 = vld [vmem:[#allocation5 + $0x8] sm:$0xff]  }
  0x4a   :  { %511 = vmatprep.subr.bf16.mxu0 %v743_v0  ;;  %527 = vmatprep.mubr.msk.bf16.mxu0 %vm744_vm0, %v743_v0  ;;  %v584_v3 = vld [vmem:[#allocation5 + $0x10] sm:$0xff]   ;;  %v591_v4 = vld [vmem:[#allocation7] sm:$0xff]   ;;  %v585_v5 = vld [vmem:[#allocation5 + $0x18] sm:$0xff]  }
  0x4b   :  { %531 = vmatprep.subr.bf16.mxu1 %v743_v0  ;;  %547 = vmatprep.mubr.msk.bf16.mxu1 %vm744_vm0, %v743_v0  ;;  %v592_v6 = vld [vmem:[#allocation7 + $0x8] sm:$0xff]   ;;  %v586_v7 = vld [vmem:[#allocation5 + $0x20] sm:$0xff]   ;;  %v593_v8 = vld [vmem:[#allocation7 + $0x10] sm:$0xff]  }
  0x4c   :  { %512 = vmatpush3.bf16.msra.mxu0 %v582_v1  ;;  %532 = vmatpush3.bf16.msra.mxu1 %v591_v4  ;;  %v587_v9 = vld [vmem:[#allocation5 + $0x28] sm:$0xff]   ;;  %v594_v10 = vld [vmem:[#allocation7 + $0x18] sm:$0xff]   ;;  %v588_v11 = vld [vmem:[#allocation5 + $0x30] sm:$0xff]  }
  0x4d   :  { %513 = vmatprep.subr.bf16.mxu0 %v743_v0  ;;  %533 = vmatprep.subr.bf16.mxu1 %v743_v0  ;;  %v589_v12 = vld [vmem:[#allocation5 + $0x38] sm:$0xff]   ;;  %v595_v14 = vld [vmem:[#allocation7 + $0x20] sm:$0xff]   ;;  %v596_v15 = vld [vmem:[#allocation7 + $0x28] sm:$0xff]  }
  0x4e   :  { %v590_v13 = vld [vmem:[#allocation2] sm:$0xff]   ;;  %v597_v16 = vld [vmem:[#allocation7 + $0x30] sm:$0xff]   ;;  %v599_v18 = vld [vmem:[#allocation8] sm:$0xff]  }
  0x4f   :  { %v598_v17 = vld [vmem:[#allocation7 + $0x38] sm:$0xff]   ;;  %v600_v19 = vld [vmem:[#allocation8 + $0x8] sm:$0xff]   ;;  %v601_v20 = vld [vmem:[#allocation8 + $0x10] sm:$0xff]  }
  0x50   :  { %514 = vmatpush3.bf16.msra.mxu0 %v583_v2  ;;  %534 = vmatpush3.bf16.msra.mxu1 %v592_v6  ;;  %v602_v21 = vld [vmem:[#allocation8 + $0x18] sm:$0xff]   ;;  %v603_v32 = vld [vmem:[#allocation8 + $0x20] sm:$0xff]   ;;  %v604_v33 = vld [vmem:[#allocation8 + $0x28] sm:$0xff]  }
  0x51   :  { %515 = vmatprep.subr.bf16.mxu0 %v743_v0  ;;  %535 = vmatprep.subr.bf16.mxu1 %v743_v0  ;;  %v456_v22 = vld [vmem:[%s915_s2] ss:$0 sm:$0xff]  ;;  %v605_v34 = vld [vmem:[#allocation8 + $0x30] sm:$0xff]  }
  0x52   :  { %v606_v35 = vld [vmem:[#allocation8 + $0x38] sm:$0xff]  }
  0x53   :  { %v466_v36 = vld [vmem:[%s917_s4] ss:$0 sm:$0xff]  ;;  %s745_s4 = smov [#allocation10]  }
  0x54   :  { %516 = vmatpush3.bf16.msra.mxu0 %v584_v3  ;;  %536 = vmatpush3.bf16.msra.mxu1 %v593_v8  ;;  %v475_v46 = vld [vmem:[%s919_s6] ss:$0 sm:$0xff]  ;;  %s442_s29 = sshll.u32 %s745_s4, 4  ;;  %s443_s29 = int_to_ptr.vmem [resolvable:$true] %s442_s29 }
  0x55   :  { %517 = vmatprep.subr.bf16.mxu0 %v743_v0  ;;  %537 = vmatprep.subr.bf16.mxu1 %v743_v0  ;;  %s707_s30 = scalar_lea.vmem %s443_s29, 256  ;;  %p712_p5 = scmp.lt.s32.totalorder %s443_s29, %s443_s29 }
  0x56   :  { %p708_p4 = scmp.ne.s32.totalorder %s443_s29, %s707_s30  ;;  %p713_p6 = scmp.lt.s32.totalorder %s707_s30, %s707_s30 }
  0x58   :  { %518 = vmatpush3.bf16.msra.mxu0 %v585_v5  ;;  %538 = vmatpush3.bf16.msra.mxu1 %v594_v10  ;;  %p714_p7 = por %p713_p6, %p712_p5 }
  0x59   :  { %519 = vmatprep.subr.bf16.mxu0 %v743_v0  ;;  %539 = vmatprep.subr.bf16.mxu1 %v743_v0 }
  0x5a   :  { %p715_p8 = pnand %p714_p7, %p708_p4 }
  0x5c   :  { %520 = vmatpush3.bf16.msra.mxu0 %v586_v7  ;;  %540 = vmatpush3.bf16.msra.mxu1 %v595_v14 }
  0x5d   :  { %521 = vmatprep.subr.bf16.mxu0 %v743_v0  ;;  %541 = vmatprep.subr.bf16.mxu1 %v743_v0 }
  0x60   :  { %522 = vmatpush3.bf16.msra.mxu0 %v587_v9  ;;  %542 = vmatpush3.bf16.msra.mxu1 %v596_v15 }
  0x61   :  { %523 = vmatprep.subr.bf16.mxu0 %v743_v0  ;;  %543 = vmatprep.subr.bf16.mxu1 %v743_v0 }
  0x64   :  { %524 = vmatpush3.bf16.msra.mxu0 %v588_v11  ;;  %544 = vmatpush3.bf16.msra.mxu1 %v597_v16 }
  0x65   :  { %525 = vmatprep.subr.bf16.mxu0 %v743_v0  ;;  %545 = vmatprep.subr.bf16.mxu1 %v743_v0 }
  0x68   :  { %526 = vmatpush3.bf16.msra.mxu0 %v589_v12  ;;  %546 = vmatpush3.bf16.msra.mxu1 %v598_v17 }
  0x69   :  { %551 = vmatprep.subr.bf16.mxu0 %v743_v0 }
  0x6b   :  { %528 = vmatmul.mubr.bf16.vlgmr.msra.gmra.mrb[0].mxu0 %v590_v13 }
  0x6c   :  { %567 = vmatprep.mubr.msk.bf16.mxu0 %vm744_vm0, %v743_v0  ;;  %552 = vmatpush3.bf16.msra.mxu0 %v599_v18 }
  0x6d   :  { %553 = vmatprep.subr.bf16.mxu0 %v743_v0 }
  0x70   :  { %554 = vmatpush3.bf16.msra.mxu0 %v600_v19 }
  0x71   :  { %555 = vmatprep.subr.bf16.mxu0 %v743_v0 }
  0x74   :  { %556 = vmatpush3.bf16.msra.mxu0 %v601_v20 }
  0x75   :  { %557 = vmatprep.subr.bf16.mxu0 %v743_v0 }
  0x78   :  { %558 = vmatpush3.bf16.msra.mxu0 %v602_v21 }
  0x79   :  { %559 = vmatprep.subr.bf16.mxu0 %v743_v0 }
  0x7c   :  { %560 = vmatpush3.bf16.msra.mxu0 %v603_v32 }
  0x7d   :  { %561 = vmatprep.subr.bf16.mxu0 %v743_v0 }
  0x80   :  { %562 = vmatpush3.bf16.msra.mxu0 %v604_v33 }
  0x81   :  { %563 = vmatprep.subr.bf16.mxu0 %v743_v0 }
  0x84   :  { %564 = vmatpush3.bf16.msra.mxu0 %v605_v34 }
  0x85   :  { %565 = vmatprep.subr.bf16.mxu0 %v743_v0 }
  0x88   :  { %566 = vmatpush3.bf16.msra.mxu0 %v606_v35 }
 0x13e   :  { %v196_v23 = vpop.f32.mrb[0].mxu0 }
 0x13f   :  { %v197_v24 = vadd.f32 %v456_v22, %v196_v23  ;;  %v529_v25 = vpop.f32.mrb[1].mxu0 }
 0x140   :  { %v199_v26 = vpop.f32.mrb[2].mxu0 }
 0x141   :  { %v200_v27 = vadd.f32 %v456_v22, %v199_v26  ;;  %v530_v28 = vpop.f32.mrb[3].mxu0  ;;  %607 = vtanh.f32 %v197_v24 }
 0x143   :  { %609 = vtanh.f32 %v200_v27 }
 0x14b   :  { %v608_v29 = vpop.eup %607 }
 0x14d   :  { %v610_v30 = vpop.eup %609 }
 0x14e   :  { %v205_v31 = vpack.c.bf16 %v610_v30, %v608_v29 }
 0x150   :  { %548 = vmatmul.mubr.bf16.vlgmr.msra.gmra.mrb[0].mxu1 %v205_v31 }
 0x223   :  { %v311_v37 = vpop.f32.mrb[0].mxu1 }
 0x224   :  { %v312_v38 = vadd.f32 %v466_v36, %v311_v37  ;;  %v549_v39 = vpop.f32.mrb[1].mxu1 }
 0x225   :  { %v314_v40 = vpop.f32.mrb[2].mxu1 }
 0x226   :  { %v315_v41 = vadd.f32 %v466_v36, %v314_v40  ;;  %v550_v42 = vpop.f32.mrb[3].mxu1  ;;  %611 = vtanh.f32 %v312_v38 }
 0x228   :  { %613 = vtanh.f32 %v315_v41 }
 0x230   :  { %v612_v43 = vpop.eup %611 }
 0x232   :  { %v614_v44 = vpop.eup %613 }
 0x233   :  { %v320_v45 = vpack.c.bf16 %v614_v44, %v612_v43 }
 0x235   :  { %568 = vmatmul.mubr.bf16.vlgmr.msra.gmra.mrb[4].mxu0 %v320_v45 }
 0x308   :  { %v426_v47 = vpop.f32.mrb[4].mxu0 }
 0x309   :  { %v427_v48 = vadd.f32 %v475_v46, %v426_v47  ;;  %v569_v49 = vpop.f32.mrb[5].mxu0 }
 0x30a   :  { %v429_v50 = vpop.f32.mrb[6].mxu0 }
 0x30b   :  { %615 = vtanh.f32 %v427_v48  ;;  %v430_v51 = vadd.f32 %v475_v46, %v429_v50  ;;  %v570_v52 = vpop.f32.mrb[7].mxu0 }
 0x30d   :  { %617 = vtanh.f32 %v430_v51 }
 0x315   :  { %v616_v53 = vpop.eup %615 }
 0x316   :  { %435 = vst [vmem:[#allocation10] sm:$0xff] %v616_v53 }
 0x317   :  { %v618_v54 = vpop.eup %617 }
 0x318   :  { %436 = vst [vmem:[#allocation10 + $0x8] sm:$0xff] %v618_v54 }
 0x319   :  { %718 = shalt.err (!%p715_p8)
}
 0x31a   :  { %s719_s9 = scalar_lea.hbm %s920_s7, 256 }
 0x31b   :  { %p720_p9 = scmp.ne.s32.totalorder %s920_s7, %s719_s9  ;;  %p723_p10 = scmp.lt.u32.totalorder %s719_s9, %s920_s7 }
 0x31d   :  { %p725_p11 = pnand %p723_p10, %p720_p9 }
 0x31f   :  { %728 = shalt.err (!%p725_p11)
}
 0x320   :  { %s746_s16 = smov 128   ;;  %s747_s0 = smov 8  }
 0x321   :  { %448 = dma.vmem_to_hbm [thread:$0]  %s443_s29, 256, %s920_s7, [#allocation4], %s746_s16, %s746_s16, %s747_s0  }
 0x322   :  { %735 = dma.done.wait [#allocation4], 256  }
 0x323   :  { %736 = vsyncadd [#allocation4], 4294967040 }
 0x324   :  { %452 = vsyncpa [#allocation3], 1 }
 0x325   :  { %453 = vsyncpa [#allocation6], 1 }
 0x326   :  { %454 = vsyncpa [#allocation9], 1 }
 0x327   :  { %455 = vsyncpa [#allocation4], 1 }

</bundles_post_ra>
